<compile_context>
chip_gen: v5e
topology: v5e:2x2
jax: 0.10.0
libtpu: 0.0.40
codegen_flags: <defaults>
</compile_context>

<pallas_src>
import functools

import jax
import jax.numpy as jnp
from jax import lax
from jax.experimental import pallas as pl
from jax.experimental.pallas import tpu as pltpu


def _vmem():
    return pl.BlockSpec(memory_space=pltpu.MemorySpace.VMEM)


def _layer_norm(x, gamma, beta, eps=1e-5):
    mean = jnp.mean(x, axis=-1, keepdims=True)
    var = jnp.mean((x - mean) ** 2, axis=-1, keepdims=True)
    inv = lax.rsqrt(var + eps)
    return (x - mean) * inv * gamma + beta


# ------------------------------ fused forward kernel ------------------------------

def fused_decoder_kernel(num_layers, num_heads,
                         x_ref, time_ref, kv_ref,
                         w_in_ref, b_in_ref,
                         wqkv_ref, bqkv_ref, woe_ref, wff_ref, vecs_ref,
                         h_out_ref):
    L = num_layers
    _, B, T, H = kv_ref.shape
    H2 = 2 * H
    nh = num_heads
    dh = H // nh
    scale = 1.0 / float(dh) ** 0.5

    # Head-selection matrices (built once, outside the layer loop). They keep the per-head
    # score / context reductions lane-dense on the MXU instead of width-dh lane slices +
    # per-head XLU reductions.
    lane_k = lax.broadcasted_iota(jnp.int32, (H2, nh), 0)
    head_k = lax.broadcasted_iota(jnp.int32, (H2, nh), 1)
    sel_k = jnp.where((lane_k >= head_k * dh) & (lane_k < (head_k + 1) * dh),
                      1.0, 0.0).astype(jnp.float32)                      # (2H, nh): picks K-half dims of head n

    head_v = lax.broadcasted_iota(jnp.int32, (nh, H2), 0)
    lane_v = lax.broadcasted_iota(jnp.int32, (nh, H2), 1)
    sel_v = jnp.where((lane_v >= H + head_v * dh) & (lane_v < H + (head_v + 1) * dh),
                      1.0, 0.0).astype(jnp.float32)                      # (nh, 2H): broadcasts p onto V-half dims

    # input = dropout(input_projection(input) + time); dropout == identity (eval).
    x_cur = (jnp.dot(x_ref[...], w_in_ref[...], preferred_element_type=jnp.float32)
             + b_in_ref[...] + time_ref[...])                            # (B, H)

    for l in range(L):  # static unroll; layers are sequentially dependent anyway
        kv = kv_ref[l]                                                   # (B, T, H)
        kv2 = kv.reshape(B * T, H)

        # Q projection zero-extended to (B, 2H) via packed [wq | 0]; K|V fused into one matmul.
        q_ext = (jnp.dot(x_cur, wqkv_ref[l, 0], preferred_element_type=jnp.float32)
                 + bqkv_ref[l, 0])                                       # (B, 2H) = [q | 0]
        kvp = (jnp.dot(kv2, wqkv_ref[l, 1], preferred_element_type=jnp.float32)
               + bqkv_ref[l, 1]).reshape(B, T, H2)                       # (B, T, 2H) = [k | v]

        # Scores: per-head dot(q, k) as an elementwise product + selection matmul (MXU).
        prod = q_ext[:, None, :] * kvp                                   # (B, T, 2H)
        s = jnp.dot(prod.reshape(B * T, H2), sel_k,
                    preferred_element_type=jnp.float32).reshape(B, T, nh) * scale

        # Softmax over the time axis.
        m = jnp.max(s, axis=1, keepdims=True)
        e = jnp.exp(s - m)
        denom = jnp.sum(e, axis=1, keepdims=True)
        p = e * pl.reciprocal(denom, approx=True)                        # (B, T, nh)

        # Context: broadcast per-head probs onto the V-half and reduce over T.
        p_ext = jnp.dot(p.reshape(B * T, nh), sel_v,
                        preferred_element_type=jnp.float32).reshape(B, T, H2)
        ctx_ext = jnp.sum(p_ext * kvp, axis=1)                           # (B, 2H); first H lanes are zero

        vl = vecs_ref[l]                                                 # (7, H)
        bo, b1, b2 = vl[0:1, :], vl[1:2, :], vl[2:3, :]
        g1, be1, g2, be2 = vl[3:4, :], vl[4:5, :], vl[5:6, :], vl[6:7, :]

        # Output projection uses [0 ; wo] so the zero K-half of ctx_ext is harmless: ctx @ wo.
        attn = jnp.dot(ctx_ext, woe_ref[l], preferred_element_type=jnp.float32) + bo
        y1 = _layer_norm(x_cur + attn, g1, be1)

        h1 = jnp.maximum(jnp.dot(y1, wff_ref[l, 0], preferred_element_type=jnp.float32) + b1, 0.0)
        h2 = jnp.dot(h1, wff_ref[l, 1], preferred_element_type=jnp.float32) + b2
        out = _layer_norm(y1 + h2, g2, be2)

        h_out_ref[l, :, :] = out
        x_cur = out


def transformer_decoder_forward(packed, x, time, h_seqs, num_heads):
    L = packed['wqkv'].shape[0]
    B, H = time.shape
    # torch.stack(h_seqs[i]).transpose(0, 1) for every layer, done once on the host.
    kv_all = jnp.stack(
        [jnp.transpose(jnp.stack(h_seqs[i], axis=0), (1, 0, 2)) for i in range(L)],
        axis=0)                                                          # (L, B, T, H)

    kernel = functools.partial(fused_decoder_kernel, L, num_heads)
    args = (x, time, kv_all,
            packed['w_in'], packed['b_in'],
            packed['wqkv'], packed['bqkv'], packed['woe'], packed['wff'], packed['vecs'])

    h_out = pl.pallas_call(
        kernel,
        out_shape=jax.ShapeDtypeStruct((L, B, H), jnp.float32),
        in_specs=[_vmem()] * len(args),
        out_specs=_vmem(),
    )(*args)

    new_h = [h_out[i] for i in range(L)]
    return h_out[L - 1], new_h


# ------------------------------- parameters & packing -------------------------------

def init_params(key, input_size, hidden_size, num_layers):
    keys = jax.random.split(key, 1 + num_layers)

    def lin(k, fan_in, fan_out):
        # nn.Linear default init; weight stored pre-transposed as (in, out).
        bound = 1.0 / float(fan_in) ** 0.5
        kw, kb = jax.random.split(k)
        w = jax.random.uniform(kw, (fan_in, fan_out), jnp.float32, -bound, bound)
        b = jax.random.uniform(kb, (1, fan_out), jnp.float32, -bound, bound)
        return w, b

    w_in, b_in = lin(keys[0], input_size, hidden_size)
    layers = []
    for i in range(num_layers):
        lk = jax.random.split(keys[1 + i], 6)
        wq, bq = lin(lk[0], hidden_size, hidden_size)
        wk, bk = lin(lk[1], hidden_size, hidden_size)
        wv, bv = lin(lk[2], hidden_size, hidden_size)
        wo, bo = lin(lk[3], hidden_size, hidden_size)
        w1, b1 = lin(lk[4], hidden_size, hidden_size)
        w2, b2 = lin(lk[5], hidden_size, hidden_size)
        layers.append(dict(
            wq=wq, bq=bq, wk=wk, bk=bk, wv=wv, bv=bv, wo=wo, bo=bo,
            g1=jnp.ones((1, hidden_size), jnp.float32),
            be1=jnp.zeros((1, hidden_size), jnp.float32),
            w1=w1, b1=b1, w2=w2, b2=b2,
            g2=jnp.ones((1, hidden_size), jnp.float32),
            be2=jnp.zeros((1, hidden_size), jnp.float32)))
    return dict(w_in=w_in, b_in=b_in, layers=layers)


def pack_params(params):
    """Pack per-layer tensors into a few stacked operands for the fused kernel."""
    H = params['w_in'].shape[1]
    zeros_w = jnp.zeros((H, H), jnp.float32)
    wqkv, bqkv, woe, wff, vecs = [], [], [], [], []
    for lp in params['layers']:
        wq_ext = jnp.concatenate([lp['wq'], zeros_w], axis=1)                       # (H, 2H) = [wq | 0]
        wkv = jnp.concatenate([lp['wk'], lp['wv']], axis=1)                         # (H, 2H) = [wk | wv]
        wqkv.append(jnp.stack([wq_ext, wkv], axis=0))                               # (2, H, 2H)

        bq_ext = jnp.concatenate([lp['bq'], jnp.zeros_like(lp['bq'])], axis=1)      # (1, 2H)
        bkv = jnp.concatenate([lp['bk'], lp['bv']], axis=1)                         # (1, 2H)
        bqkv.append(jnp.stack([bq_ext, bkv], axis=0))                               # (2, 1, 2H)

        woe.append(jnp.concatenate([zeros_w, lp['wo']], axis=0))                    # (2H, H) = [0 ; wo]
        wff.append(jnp.stack([lp['w1'], lp['w2']], axis=0))                         # (2, H, H)
        vecs.append(jnp.concatenate([lp['bo'], lp['b1'], lp['b2'],
                                     lp['g1'], lp['be1'], lp['g2'], lp['be2']],
                                    axis=0))                                        # (7, H)
    return dict(w_in=params['w_in'], b_in=params['b_in'],
                wqkv=jnp.stack(wqkv, axis=0), bqkv=jnp.stack(bqkv, axis=0),
                woe=jnp.stack(woe, axis=0), wff=jnp.stack(wff, axis=0),
                vecs=jnp.stack(vecs, axis=0))


# --------------------------------------- main ---------------------------------------

if __name__ == "__main__":
    B, input_size, hidden_size, heads, num_layers, T = 2, 24, 32, 4, 2, 8

    key = jax.random.PRNGKey(0)
    k_params, k_x, k_t, k_h = jax.random.split(key, 4)

    params = init_params(k_params, input_size, hidden_size, num_layers)
    packed = pack_params(params)

    x = jax.random.normal(k_x, (B, input_size), jnp.float32)
    time = jax.random.normal(k_t, (B, hidden_size), jnp.float32)

    hkeys = jax.random.split(k_h, num_layers * T)
    h_seqs = [[jax.random.normal(hkeys[i * T + t], (B, hidden_size), jnp.float32)
               for t in range(T)] for i in range(num_layers)]

    out, new_h = transformer_decoder_forward(packed, x, time, h_seqs, heads)
    jax.block_until_ready(out)
    jax.block_until_ready(new_h)
    assert out.shape == (B, hidden_size) and len(new_h) == num_layers
    print("KERNEL_OK")
</pallas_src>

<mosaic_0001>
module attributes {stable_mosaic.version = 11 : i64} {
  func.func @fused_decoder_kernel(%arg0: memref<2x24xf32, #tpu.memory_space<vmem>>, %arg1: memref<2x32xf32, #tpu.memory_space<vmem>>, %arg2: memref<2x2x8x32xf32, #tpu.memory_space<vmem>>, %arg3: memref<24x32xf32, #tpu.memory_space<vmem>>, %arg4: memref<1x32xf32, #tpu.memory_space<vmem>>, %arg5: memref<2x2x32x64xf32, #tpu.memory_space<vmem>>, %arg6: memref<2x2x1x64xf32, #tpu.memory_space<vmem>>, %arg7: memref<2x64x32xf32, #tpu.memory_space<vmem>>, %arg8: memref<2x2x32x32xf32, #tpu.memory_space<vmem>>, %arg9: memref<2x7x32xf32, #tpu.memory_space<vmem>>, %arg10: memref<2x2x32xf32, #tpu.memory_space<vmem>>) attributes {dimension_semantics = [], scalar_prefetch = 0 : i64, scratch_operands = 0 : i64, tpu.core_type = #tpu.core_type<tc>} {
    %0 = tpu.iota {dimensions = array<i32: 0>} : vector<64x4xi32>
    %1 = tpu.iota {dimensions = array<i32: 1>} : vector<64x4xi32>
    %c8_i32 = arith.constant 8 : i32
    %2 = vector.broadcast %c8_i32 : i32 to vector<64x4xi32>
    %3 = arith.muli %1, %2 : vector<64x4xi32>
    %4 = arith.cmpi sge, %0, %3 : vector<64x4xi32>
    %c1_i32 = arith.constant 1 : i32
    %5 = vector.broadcast %c1_i32 : i32 to vector<64x4xi32>
    %6 = arith.addi %1, %5 : vector<64x4xi32>
    %c8_i32_0 = arith.constant 8 : i32
    %7 = vector.broadcast %c8_i32_0 : i32 to vector<64x4xi32>
    %8 = arith.muli %6, %7 : vector<64x4xi32>
    %9 = arith.cmpi slt, %0, %8 : vector<64x4xi32>
    %10 = arith.andi %4, %9 : vector<64x4xi1>
    %cst = arith.constant 1.000000e+00 : f32
    %cst_1 = arith.constant 0.000000e+00 : f32
    %11 = vector.broadcast %cst : f32 to vector<64x4xf32>
    %12 = vector.broadcast %cst_1 : f32 to vector<64x4xf32>
    %13 = arith.select %10, %11, %12 : vector<64x4xi1>, vector<64x4xf32>
    %14 = tpu.iota {dimensions = array<i32: 0>} : vector<4x64xi32>
    %15 = tpu.iota {dimensions = array<i32: 1>} : vector<4x64xi32>
    %c8_i32_2 = arith.constant 8 : i32
    %16 = vector.broadcast %c8_i32_2 : i32 to vector<4x64xi32>
    %17 = arith.muli %14, %16 : vector<4x64xi32>
    %c32_i32 = arith.constant 32 : i32
    %18 = vector.broadcast %c32_i32 : i32 to vector<4x64xi32>
    %19 = arith.addi %18, %17 : vector<4x64xi32>
    %20 = arith.cmpi sge, %15, %19 : vector<4x64xi32>
    %c1_i32_3 = arith.constant 1 : i32
    %21 = vector.broadcast %c1_i32_3 : i32 to vector<4x64xi32>
    %22 = arith.addi %14, %21 : vector<4x64xi32>
    %c8_i32_4 = arith.constant 8 : i32
    %23 = vector.broadcast %c8_i32_4 : i32 to vector<4x64xi32>
    %24 = arith.muli %22, %23 : vector<4x64xi32>
    %c32_i32_5 = arith.constant 32 : i32
    %25 = vector.broadcast %c32_i32_5 : i32 to vector<4x64xi32>
    %26 = arith.addi %25, %24 : vector<4x64xi32>
    %27 = arith.cmpi slt, %15, %26 : vector<4x64xi32>
    %28 = arith.andi %20, %27 : vector<4x64xi1>
    %cst_6 = arith.constant 1.000000e+00 : f32
    %cst_7 = arith.constant 0.000000e+00 : f32
    %29 = vector.broadcast %cst_6 : f32 to vector<4x64xf32>
    %30 = vector.broadcast %cst_7 : f32 to vector<4x64xf32>
    %31 = arith.select %28, %29, %30 : vector<4x64xi1>, vector<4x64xf32>
    %c0 = arith.constant 0 : index
    %c0_8 = arith.constant 0 : index
    %32 = vector.load %arg0[%c0, %c0_8] : memref<2x24xf32, #tpu.memory_space<vmem>>, vector<2x24xf32>
    %c0_9 = arith.constant 0 : index
    %c0_10 = arith.constant 0 : index
    %33 = vector.load %arg3[%c0_9, %c0_10] : memref<24x32xf32, #tpu.memory_space<vmem>>, vector<24x32xf32>
    %cst_11 = arith.constant dense<0.000000e+00> : vector<2x32xf32>
    %34 = tpu.matmul %32, %33, %cst_11 {dimension_numbers = #tpu.dot_dimension_numbers<[1], [0], [0], [1], [0, 0, 1, 1], [], []>} : vector<2x24xf32>, vector<24x32xf32>, vector<2x32xf32> -> vector<2x32xf32>
    %c0_12 = arith.constant 0 : index
    %c0_13 = arith.constant 0 : index
    %35 = vector.load %arg4[%c0_12, %c0_13] : memref<1x32xf32, #tpu.memory_space<vmem>>, vector<1x32xf32>
    %36 = vector.broadcast %35 : vector<1x32xf32> to vector<2x32xf32>
    %37 = arith.addf %34, %36 : vector<2x32xf32>
    %c0_14 = arith.constant 0 : index
    %c0_15 = arith.constant 0 : index
    %38 = vector.load %arg1[%c0_14, %c0_15] : memref<2x32xf32, #tpu.memory_space<vmem>>, vector<2x32xf32>
    %39 = arith.addf %37, %38 : vector<2x32xf32>
    %c0_16 = arith.constant 0 : index
    %c0_17 = arith.constant 0 : index
    %c0_18 = arith.constant 0 : index
    %c0_19 = arith.constant 0 : index
    %40 = vector.load %arg2[%c0_16, %c0_17, %c0_18, %c0_19] : memref<2x2x8x32xf32, #tpu.memory_space<vmem>>, vector<1x2x8x32xf32>
    %41 = vector.shape_cast %40 : vector<1x2x8x32xf32> to vector<2x8x32xf32>
    %42 = vector.shape_cast %41 : vector<2x8x32xf32> to vector<16x32xf32>
    %c0_20 = arith.constant 0 : index
    %c0_21 = arith.constant 0 : index
    %c0_22 = arith.constant 0 : index
    %c0_23 = arith.constant 0 : index
    %43 = vector.load %arg5[%c0_20, %c0_21, %c0_22, %c0_23] : memref<2x2x32x64xf32, #tpu.memory_space<vmem>>, vector<1x1x32x64xf32>
    %44 = vector.shape_cast %43 : vector<1x1x32x64xf32> to vector<32x64xf32>
    %cst_24 = arith.constant dense<0.000000e+00> : vector<2x64xf32>
    %45 = tpu.matmul %39, %44, %cst_24 {dimension_numbers = #tpu.dot_dimension_numbers<[1], [0], [0], [1], [0, 0, 1, 1], [], []>} : vector<2x32xf32>, vector<32x64xf32>, vector<2x64xf32> -> vector<2x64xf32>
    %c0_25 = arith.constant 0 : index
    %c0_26 = arith.constant 0 : index
    %c0_27 = arith.constant 0 : index
    %c0_28 = arith.constant 0 : index
    %46 = vector.load %arg6[%c0_25, %c0_26, %c0_27, %c0_28] : memref<2x2x1x64xf32, #tpu.memory_space<vmem>>, vector<1x1x1x64xf32>
    %47 = vector.shape_cast %46 : vector<1x1x1x64xf32> to vector<1x64xf32>
    %48 = vector.broadcast %47 : vector<1x64xf32> to vector<2x64xf32>
    %49 = arith.addf %45, %48 : vector<2x64xf32>
    %c0_29 = arith.constant 0 : index
    %c1 = arith.constant 1 : index
    %c0_30 = arith.constant 0 : index
    %c0_31 = arith.constant 0 : index
    %50 = vector.load %arg5[%c0_29, %c1, %c0_30, %c0_31] : memref<2x2x32x64xf32, #tpu.memory_space<vmem>>, vector<1x1x32x64xf32>
    %51 = vector.shape_cast %50 : vector<1x1x32x64xf32> to vector<32x64xf32>
    %cst_32 = arith.constant dense<0.000000e+00> : vector<16x64xf32>
    %52 = tpu.matmul %42, %51, %cst_32 {dimension_numbers = #tpu.dot_dimension_numbers<[1], [0], [0], [1], [0, 0, 1, 1], [], []>} : vector<16x32xf32>, vector<32x64xf32>, vector<16x64xf32> -> vector<16x64xf32>
    %c0_33 = arith.constant 0 : index
    %c1_34 = arith.constant 1 : index
    %c0_35 = arith.constant 0 : index
    %c0_36 = arith.constant 0 : index
    %53 = vector.load %arg6[%c0_33, %c1_34, %c0_35, %c0_36] : memref<2x2x1x64xf32, #tpu.memory_space<vmem>>, vector<1x1x1x64xf32>
    %54 = vector.shape_cast %53 : vector<1x1x1x64xf32> to vector<1x64xf32>
    %55 = vector.broadcast %54 : vector<1x64xf32> to vector<16x64xf32>
    %56 = arith.addf %52, %55 : vector<16x64xf32>
    %57 = vector.shape_cast %56 : vector<16x64xf32> to vector<2x8x64xf32>
    %58 = vector.shape_cast %49 : vector<2x64xf32> to vector<2x1x64xf32>
    %59 = vector.broadcast %58 : vector<2x1x64xf32> to vector<2x8x64xf32>
    %60 = arith.mulf %59, %57 : vector<2x8x64xf32>
    %61 = vector.shape_cast %60 : vector<2x8x64xf32> to vector<16x64xf32>
    %cst_37 = arith.constant dense<0.000000e+00> : vector<16x4xf32>
    %62 = tpu.matmul %61, %13, %cst_37 {dimension_numbers = #tpu.dot_dimension_numbers<[1], [0], [0], [1], [0, 0, 1, 1], [], []>} : vector<16x64xf32>, vector<64x4xf32>, vector<16x4xf32> -> vector<16x4xf32>
    %63 = vector.shape_cast %62 : vector<16x4xf32> to vector<2x8x4xf32>
    %cst_38 = arith.constant 0.353553385 : f32
    %64 = vector.broadcast %cst_38 : f32 to vector<2x8x4xf32>
    %65 = arith.mulf %63, %64 : vector<2x8x4xf32>
    %cst_39 = arith.constant dense<0xFF800000> : vector<2x4xf32>
    %66 = vector.multi_reduction <maximumf>, %65, %cst_39 [1] : vector<2x8x4xf32> to vector<2x4xf32>
    %67 = vector.shape_cast %66 : vector<2x4xf32> to vector<2x1x4xf32>
    %68 = vector.broadcast %67 : vector<2x1x4xf32> to vector<2x8x4xf32>
    %69 = arith.subf %65, %68 : vector<2x8x4xf32>
    %70 = math.exp %69 : vector<2x8x4xf32>
    %cst_40 = arith.constant dense<0.000000e+00> : vector<2x4xf32>
    %71 = vector.multi_reduction <add>, %70, %cst_40 [1] : vector<2x8x4xf32> to vector<2x4xf32>
    %72 = vector.shape_cast %71 : vector<2x4xf32> to vector<2x1x4xf32>
    %73 = tpu.reciprocal %72 {approx = true} : vector<2x1x4xf32> -> vector<2x1x4xf32>
    %74 = vector.broadcast %73 : vector<2x1x4xf32> to vector<2x8x4xf32>
    %75 = arith.mulf %70, %74 : vector<2x8x4xf32>
    %76 = vector.shape_cast %75 : vector<2x8x4xf32> to vector<16x4xf32>
    %cst_41 = arith.constant dense<0.000000e+00> : vector<16x64xf32>
    %77 = tpu.matmul %76, %31, %cst_41 {dimension_numbers = #tpu.dot_dimension_numbers<[1], [0], [0], [1], [0, 0, 1, 1], [], []>} : vector<16x4xf32>, vector<4x64xf32>, vector<16x64xf32> -> vector<16x64xf32>
    %78 = vector.shape_cast %77 : vector<16x64xf32> to vector<2x8x64xf32>
    %79 = arith.mulf %78, %57 : vector<2x8x64xf32>
    %cst_42 = arith.constant dense<0.000000e+00> : vector<2x64xf32>
    %80 = vector.multi_reduction <add>, %79, %cst_42 [1] : vector<2x8x64xf32> to vector<2x64xf32>
    %c0_43 = arith.constant 0 : index
    %c0_44 = arith.constant 0 : index
    %c0_45 = arith.constant 0 : index
    %81 = vector.load %arg9[%c0_43, %c0_44, %c0_45] : memref<2x7x32xf32, #tpu.memory_space<vmem>>, vector<1x7x32xf32>
    %82 = vector.shape_cast %81 : vector<1x7x32xf32> to vector<7x32xf32>
    %83 = vector.extract_strided_slice %82 {offsets = [0, 0], sizes = [1, 32], strides = [1, 1]} : vector<7x32xf32> to vector<1x32xf32>
    %84 = vector.extract_strided_slice %82 {offsets = [1, 0], sizes = [1, 32], strides = [1, 1]} : vector<7x32xf32> to vector<1x32xf32>
    %85 = vector.extract_strided_slice %82 {offsets = [2, 0], sizes = [1, 32], strides = [1, 1]} : vector<7x32xf32> to vector<1x32xf32>
    %86 = vector.extract_strided_slice %82 {offsets = [3, 0], sizes = [1, 32], strides = [1, 1]} : vector<7x32xf32> to vector<1x32xf32>
    %87 = vector.extract_strided_slice %82 {offsets = [4, 0], sizes = [1, 32], strides = [1, 1]} : vector<7x32xf32> to vector<1x32xf32>
    %88 = vector.extract_strided_slice %82 {offsets = [5, 0], sizes = [1, 32], strides = [1, 1]} : vector<7x32xf32> to vector<1x32xf32>
    %89 = vector.extract_strided_slice %82 {offsets = [6, 0], sizes = [1, 32], strides = [1, 1]} : vector<7x32xf32> to vector<1x32xf32>
    %c0_46 = arith.constant 0 : index
    %c0_47 = arith.constant 0 : index
    %c0_48 = arith.constant 0 : index
    %90 = vector.load %arg7[%c0_46, %c0_47, %c0_48] : memref<2x64x32xf32, #tpu.memory_space<vmem>>, vector<1x64x32xf32>
    %91 = vector.shape_cast %90 : vector<1x64x32xf32> to vector<64x32xf32>
    %cst_49 = arith.constant dense<0.000000e+00> : vector<2x32xf32>
    %92 = tpu.matmul %80, %91, %cst_49 {dimension_numbers = #tpu.dot_dimension_numbers<[1], [0], [0], [1], [0, 0, 1, 1], [], []>} : vector<2x64xf32>, vector<64x32xf32>, vector<2x32xf32> -> vector<2x32xf32>
    %93 = vector.broadcast %83 : vector<1x32xf32> to vector<2x32xf32>
    %94 = arith.addf %92, %93 : vector<2x32xf32>
    %95 = arith.addf %39, %94 : vector<2x32xf32>
    %cst_50 = arith.constant dense<0.000000e+00> : vector<2xf32>
    %96 = vector.multi_reduction <add>, %95, %cst_50 [1] : vector<2x32xf32> to vector<2xf32>
    %97 = vector.shape_cast %96 : vector<2xf32> to vector<2x1xf32>
    %cst_51 = arith.constant 3.200000e+01 : f32
    %98 = vector.broadcast %cst_51 : f32 to vector<2x1xf32>
    %99 = arith.divf %97, %98 : vector<2x1xf32>
    %100 = vector.broadcast %99 : vector<2x1xf32> to vector<2x32xf32>
    %101 = arith.subf %95, %100 : vector<2x32xf32>
    %102 = arith.mulf %101, %101 : vector<2x32xf32>
    %cst_52 = arith.constant dense<0.000000e+00> : vector<2xf32>
    %103 = vector.multi_reduction <add>, %102, %cst_52 [1] : vector<2x32xf32> to vector<2xf32>
    %104 = vector.shape_cast %103 : vector<2xf32> to vector<2x1xf32>
    %cst_53 = arith.constant 3.200000e+01 : f32
    %105 = vector.broadcast %cst_53 : f32 to vector<2x1xf32>
    %106 = arith.divf %104, %105 : vector<2x1xf32>
    %cst_54 = arith.constant 9.99999974E-6 : f32
    %107 = vector.broadcast %cst_54 : f32 to vector<2x1xf32>
    %108 = arith.addf %106, %107 : vector<2x1xf32>
    %109 = math.rsqrt %108 : vector<2x1xf32>
    %110 = vector.broadcast %99 : vector<2x1xf32> to vector<2x32xf32>
    %111 = arith.subf %95, %110 : vector<2x32xf32>
    %112 = vector.broadcast %109 : vector<2x1xf32> to vector<2x32xf32>
    %113 = arith.mulf %111, %112 : vector<2x32xf32>
    %114 = vector.broadcast %86 : vector<1x32xf32> to vector<2x32xf32>
    %115 = arith.mulf %113, %114 : vector<2x32xf32>
    %116 = vector.broadcast %87 : vector<1x32xf32> to vector<2x32xf32>
    %117 = arith.addf %115, %116 : vector<2x32xf32>
    %c0_55 = arith.constant 0 : index
    %c0_56 = arith.constant 0 : index
    %c0_57 = arith.constant 0 : index
    %c0_58 = arith.constant 0 : index
    %118 = vector.load %arg8[%c0_55, %c0_56, %c0_57, %c0_58] : memref<2x2x32x32xf32, #tpu.memory_space<vmem>>, vector<1x1x32x32xf32>
    %119 = vector.shape_cast %118 : vector<1x1x32x32xf32> to vector<32x32xf32>
    %cst_59 = arith.constant dense<0.000000e+00> : vector<2x32xf32>
    %120 = tpu.matmul %117, %119, %cst_59 {dimension_numbers = #tpu.dot_dimension_numbers<[1], [0], [0], [1], [0, 0, 1, 1], [], []>} : vector<2x32xf32>, vector<32x32xf32>, vector<2x32xf32> -> vector<2x32xf32>
    %121 = vector.broadcast %84 : vector<1x32xf32> to vector<2x32xf32>
    %122 = arith.addf %120, %121 : vector<2x32xf32>
    %cst_60 = arith.constant 0.000000e+00 : f32
    %123 = vector.broadcast %cst_60 : f32 to vector<2x32xf32>
    %124 = arith.maximumf %122, %123 : vector<2x32xf32>
    %c0_61 = arith.constant 0 : index
    %c1_62 = arith.constant 1 : index
    %c0_63 = arith.constant 0 : index
    %c0_64 = arith.constant 0 : index
    %125 = vector.load %arg8[%c0_61, %c1_62, %c0_63, %c0_64] : memref<2x2x32x32xf32, #tpu.memory_space<vmem>>, vector<1x1x32x32xf32>
    %126 = vector.shape_cast %125 : vector<1x1x32x32xf32> to vector<32x32xf32>
    %cst_65 = arith.constant dense<0.000000e+00> : vector<2x32xf32>
    %127 = tpu.matmul %124, %126, %cst_65 {dimension_numbers = #tpu.dot_dimension_numbers<[1], [0], [0], [1], [0, 0, 1, 1], [], []>} : vector<2x32xf32>, vector<32x32xf32>, vector<2x32xf32> -> vector<2x32xf32>
    %128 = vector.broadcast %85 : vector<1x32xf32> to vector<2x32xf32>
    %129 = arith.addf %127, %128 : vector<2x32xf32>
    %130 = arith.addf %117, %129 : vector<2x32xf32>
    %cst_66 = arith.constant dense<0.000000e+00> : vector<2xf32>
    %131 = vector.multi_reduction <add>, %130, %cst_66 [1] : vector<2x32xf32> to vector<2xf32>
    %132 = vector.shape_cast %131 : vector<2xf32> to vector<2x1xf32>
    %cst_67 = arith.constant 3.200000e+01 : f32
    %133 = vector.broadcast %cst_67 : f32 to vector<2x1xf32>
    %134 = arith.divf %132, %133 : vector<2x1xf32>
    %135 = vector.broadcast %134 : vector<2x1xf32> to vector<2x32xf32>
    %136 = arith.subf %130, %135 : vector<2x32xf32>
    %137 = arith.mulf %136, %136 : vector<2x32xf32>
    %cst_68 = arith.constant dense<0.000000e+00> : vector<2xf32>
    %138 = vector.multi_reduction <add>, %137, %cst_68 [1] : vector<2x32xf32> to vector<2xf32>
    %139 = vector.shape_cast %138 : vector<2xf32> to vector<2x1xf32>
    %cst_69 = arith.constant 3.200000e+01 : f32
    %140 = vector.broadcast %cst_69 : f32 to vector<2x1xf32>
    %141 = arith.divf %139, %140 : vector<2x1xf32>
    %cst_70 = arith.constant 9.99999974E-6 : f32
    %142 = vector.broadcast %cst_70 : f32 to vector<2x1xf32>
    %143 = arith.addf %141, %142 : vector<2x1xf32>
    %144 = math.rsqrt %143 : vector<2x1xf32>
    %145 = vector.broadcast %134 : vector<2x1xf32> to vector<2x32xf32>
    %146 = arith.subf %130, %145 : vector<2x32xf32>
    %147 = vector.broadcast %144 : vector<2x1xf32> to vector<2x32xf32>
    %148 = arith.mulf %146, %147 : vector<2x32xf32>
    %149 = vector.broadcast %88 : vector<1x32xf32> to vector<2x32xf32>
    %150 = arith.mulf %148, %149 : vector<2x32xf32>
    %151 = vector.broadcast %89 : vector<1x32xf32> to vector<2x32xf32>
    %152 = arith.addf %150, %151 : vector<2x32xf32>
    %c0_71 = arith.constant 0 : index
    %c0_72 = arith.constant 0 : index
    %c0_73 = arith.constant 0 : index
    %153 = vector.load %arg10[%c0_71, %c0_72, %c0_73] : memref<2x2x32xf32, #tpu.memory_space<vmem>>, vector<1x2x32xf32>
    %154 = vector.shape_cast %153 : vector<1x2x32xf32> to vector<2x32xf32>
    %155 = vector.shape_cast %152 : vector<2x32xf32> to vector<1x2x32xf32>
    tpu.vector_store %arg10[%c0_71, %c0_72, %c0_73], %155 {strides = array<i32>} : memref<2x2x32xf32, #tpu.memory_space<vmem>>, vector<1x2x32xf32>,
    %c1_74 = arith.constant 1 : index
    %c0_75 = arith.constant 0 : index
    %c0_76 = arith.constant 0 : index
    %c0_77 = arith.constant 0 : index
    %156 = vector.load %arg2[%c1_74, %c0_75, %c0_76, %c0_77] : memref<2x2x8x32xf32, #tpu.memory_space<vmem>>, vector<1x2x8x32xf32>
    %157 = vector.shape_cast %156 : vector<1x2x8x32xf32> to vector<2x8x32xf32>
    %158 = vector.shape_cast %157 : vector<2x8x32xf32> to vector<16x32xf32>
    %c1_78 = arith.constant 1 : index
    %c0_79 = arith.constant 0 : index
    %c0_80 = arith.constant 0 : index
    %c0_81 = arith.constant 0 : index
    %159 = vector.load %arg5[%c1_78, %c0_79, %c0_80, %c0_81] : memref<2x2x32x64xf32, #tpu.memory_space<vmem>>, vector<1x1x32x64xf32>
    %160 = vector.shape_cast %159 : vector<1x1x32x64xf32> to vector<32x64xf32>
    %cst_82 = arith.constant dense<0.000000e+00> : vector<2x64xf32>
    %161 = tpu.matmul %152, %160, %cst_82 {dimension_numbers = #tpu.dot_dimension_numbers<[1], [0], [0], [1], [0, 0, 1, 1], [], []>} : vector<2x32xf32>, vector<32x64xf32>, vector<2x64xf32> -> vector<2x64xf32>
    %c1_83 = arith.constant 1 : index
    %c0_84 = arith.constant 0 : index
    %c0_85 = arith.constant 0 : index
    %c0_86 = arith.constant 0 : index
    %162 = vector.load %arg6[%c1_83, %c0_84, %c0_85, %c0_86] : memref<2x2x1x64xf32, #tpu.memory_space<vmem>>, vector<1x1x1x64xf32>
    %163 = vector.shape_cast %162 : vector<1x1x1x64xf32> to vector<1x64xf32>
    %164 = vector.broadcast %163 : vector<1x64xf32> to vector<2x64xf32>
    %165 = arith.addf %161, %164 : vector<2x64xf32>
    %c1_87 = arith.constant 1 : index
    %c1_88 = arith.constant 1 : index
    %c0_89 = arith.constant 0 : index
    %c0_90 = arith.constant 0 : index
    %166 = vector.load %arg5[%c1_87, %c1_88, %c0_89, %c0_90] : memref<2x2x32x64xf32, #tpu.memory_space<vmem>>, vector<1x1x32x64xf32>
    %167 = vector.shape_cast %166 : vector<1x1x32x64xf32> to vector<32x64xf32>
    %cst_91 = arith.constant dense<0.000000e+00> : vector<16x64xf32>
    %168 = tpu.matmul %158, %167, %cst_91 {dimension_numbers = #tpu.dot_dimension_numbers<[1], [0], [0], [1], [0, 0, 1, 1], [], []>} : vector<16x32xf32>, vector<32x64xf32>, vector<16x64xf32> -> vector<16x64xf32>
    %c1_92 = arith.constant 1 : index
    %c1_93 = arith.constant 1 : index
    %c0_94 = arith.constant 0 : index
    %c0_95 = arith.constant 0 : index
    %169 = vector.load %arg6[%c1_92, %c1_93, %c0_94, %c0_95] : memref<2x2x1x64xf32, #tpu.memory_space<vmem>>, vector<1x1x1x64xf32>
    %170 = vector.shape_cast %169 : vector<1x1x1x64xf32> to vector<1x64xf32>
    %171 = vector.broadcast %170 : vector<1x64xf32> to vector<16x64xf32>
    %172 = arith.addf %168, %171 : vector<16x64xf32>
    %173 = vector.shape_cast %172 : vector<16x64xf32> to vector<2x8x64xf32>
    %174 = vector.shape_cast %165 : vector<2x64xf32> to vector<2x1x64xf32>
    %175 = vector.broadcast %174 : vector<2x1x64xf32> to vector<2x8x64xf32>
    %176 = arith.mulf %175, %173 : vector<2x8x64xf32>
    %177 = vector.shape_cast %176 : vector<2x8x64xf32> to vector<16x64xf32>
    %cst_96 = arith.constant dense<0.000000e+00> : vector<16x4xf32>
    %178 = tpu.matmul %177, %13, %cst_96 {dimension_numbers = #tpu.dot_dimension_numbers<[1], [0], [0], [1], [0, 0, 1, 1], [], []>} : vector<16x64xf32>, vector<64x4xf32>, vector<16x4xf32> -> vector<16x4xf32>
    %179 = vector.shape_cast %178 : vector<16x4xf32> to vector<2x8x4xf32>
    %cst_97 = arith.constant 0.353553385 : f32
    %180 = vector.broadcast %cst_97 : f32 to vector<2x8x4xf32>
    %181 = arith.mulf %179, %180 : vector<2x8x4xf32>
    %cst_98 = arith.constant dense<0xFF800000> : vector<2x4xf32>
    %182 = vector.multi_reduction <maximumf>, %181, %cst_98 [1] : vector<2x8x4xf32> to vector<2x4xf32>
    %183 = vector.shape_cast %182 : vector<2x4xf32> to vector<2x1x4xf32>
    %184 = vector.broadcast %183 : vector<2x1x4xf32> to vector<2x8x4xf32>
    %185 = arith.subf %181, %184 : vector<2x8x4xf32>
    %186 = math.exp %185 : vector<2x8x4xf32>
    %cst_99 = arith.constant dense<0.000000e+00> : vector<2x4xf32>
    %187 = vector.multi_reduction <add>, %186, %cst_99 [1] : vector<2x8x4xf32> to vector<2x4xf32>
    %188 = vector.shape_cast %187 : vector<2x4xf32> to vector<2x1x4xf32>
    %189 = tpu.reciprocal %188 {approx = true} : vector<2x1x4xf32> -> vector<2x1x4xf32>
    %190 = vector.broadcast %189 : vector<2x1x4xf32> to vector<2x8x4xf32>
    %191 = arith.mulf %186, %190 : vector<2x8x4xf32>
    %192 = vector.shape_cast %191 : vector<2x8x4xf32> to vector<16x4xf32>
    %cst_100 = arith.constant dense<0.000000e+00> : vector<16x64xf32>
    %193 = tpu.matmul %192, %31, %cst_100 {dimension_numbers = #tpu.dot_dimension_numbers<[1], [0], [0], [1], [0, 0, 1, 1], [], []>} : vector<16x4xf32>, vector<4x64xf32>, vector<16x64xf32> -> vector<16x64xf32>
    %194 = vector.shape_cast %193 : vector<16x64xf32> to vector<2x8x64xf32>
    %195 = arith.mulf %194, %173 : vector<2x8x64xf32>
    %cst_101 = arith.constant dense<0.000000e+00> : vector<2x64xf32>
    %196 = vector.multi_reduction <add>, %195, %cst_101 [1] : vector<2x8x64xf32> to vector<2x64xf32>
    %c1_102 = arith.constant 1 : index
    %c0_103 = arith.constant 0 : index
    %c0_104 = arith.constant 0 : index
    %197 = vector.load %arg9[%c1_102, %c0_103, %c0_104] : memref<2x7x32xf32, #tpu.memory_space<vmem>>, vector<1x7x32xf32>
    %198 = vector.shape_cast %197 : vector<1x7x32xf32> to vector<7x32xf32>
    %199 = vector.extract_strided_slice %198 {offsets = [0, 0], sizes = [1, 32], strides = [1, 1]} : vector<7x32xf32> to vector<1x32xf32>
    %200 = vector.extract_strided_slice %198 {offsets = [1, 0], sizes = [1, 32], strides = [1, 1]} : vector<7x32xf32> to vector<1x32xf32>
    %201 = vector.extract_strided_slice %198 {offsets = [2, 0], sizes = [1, 32], strides = [1, 1]} : vector<7x32xf32> to vector<1x32xf32>
    %202 = vector.extract_strided_slice %198 {offsets = [3, 0], sizes = [1, 32], strides = [1, 1]} : vector<7x32xf32> to vector<1x32xf32>
    %203 = vector.extract_strided_slice %198 {offsets = [4, 0], sizes = [1, 32], strides = [1, 1]} : vector<7x32xf32> to vector<1x32xf32>
    %204 = vector.extract_strided_slice %198 {offsets = [5, 0], sizes = [1, 32], strides = [1, 1]} : vector<7x32xf32> to vector<1x32xf32>
    %205 = vector.extract_strided_slice %198 {offsets = [6, 0], sizes = [1, 32], strides = [1, 1]} : vector<7x32xf32> to vector<1x32xf32>
    %c1_105 = arith.constant 1 : index
    %c0_106 = arith.constant 0 : index
    %c0_107 = arith.constant 0 : index
    %206 = vector.load %arg7[%c1_105, %c0_106, %c0_107] : memref<2x64x32xf32, #tpu.memory_space<vmem>>, vector<1x64x32xf32>
    %207 = vector.shape_cast %206 : vector<1x64x32xf32> to vector<64x32xf32>
    %cst_108 = arith.constant dense<0.000000e+00> : vector<2x32xf32>
    %208 = tpu.matmul %196, %207, %cst_108 {dimension_numbers = #tpu.dot_dimension_numbers<[1], [0], [0], [1], [0, 0, 1, 1], [], []>} : vector<2x64xf32>, vector<64x32xf32>, vector<2x32xf32> -> vector<2x32xf32>
    %209 = vector.broadcast %199 : vector<1x32xf32> to vector<2x32xf32>
    %210 = arith.addf %208, %209 : vector<2x32xf32>
    %211 = arith.addf %152, %210 : vector<2x32xf32>
    %cst_109 = arith.constant dense<0.000000e+00> : vector<2xf32>
    %212 = vector.multi_reduction <add>, %211, %cst_109 [1] : vector<2x32xf32> to vector<2xf32>
    %213 = vector.shape_cast %212 : vector<2xf32> to vector<2x1xf32>
    %cst_110 = arith.constant 3.200000e+01 : f32
    %214 = vector.broadcast %cst_110 : f32 to vector<2x1xf32>
    %215 = arith.divf %213, %214 : vector<2x1xf32>
    %216 = vector.broadcast %215 : vector<2x1xf32> to vector<2x32xf32>
    %217 = arith.subf %211, %216 : vector<2x32xf32>
    %218 = arith.mulf %217, %217 : vector<2x32xf32>
    %cst_111 = arith.constant dense<0.000000e+00> : vector<2xf32>
    %219 = vector.multi_reduction <add>, %218, %cst_111 [1] : vector<2x32xf32> to vector<2xf32>
    %220 = vector.shape_cast %219 : vector<2xf32> to vector<2x1xf32>
    %cst_112 = arith.constant 3.200000e+01 : f32
    %221 = vector.broadcast %cst_112 : f32 to vector<2x1xf32>
    %222 = arith.divf %220, %221 : vector<2x1xf32>
    %cst_113 = arith.constant 9.99999974E-6 : f32
    %223 = vector.broadcast %cst_113 : f32 to vector<2x1xf32>
    %224 = arith.addf %222, %223 : vector<2x1xf32>
    %225 = math.rsqrt %224 : vector<2x1xf32>
    %226 = vector.broadcast %215 : vector<2x1xf32> to vector<2x32xf32>
    %227 = arith.subf %211, %226 : vector<2x32xf32>
    %228 = vector.broadcast %225 : vector<2x1xf32> to vector<2x32xf32>
    %229 = arith.mulf %227, %228 : vector<2x32xf32>
    %230 = vector.broadcast %202 : vector<1x32xf32> to vector<2x32xf32>
    %231 = arith.mulf %229, %230 : vector<2x32xf32>
    %232 = vector.broadcast %203 : vector<1x32xf32> to vector<2x32xf32>
    %233 = arith.addf %231, %232 : vector<2x32xf32>
    %c1_114 = arith.constant 1 : index
    %c0_115 = arith.constant 0 : index
    %c0_116 = arith.constant 0 : index
    %c0_117 = arith.constant 0 : index
    %234 = vector.load %arg8[%c1_114, %c0_115, %c0_116, %c0_117] : memref<2x2x32x32xf32, #tpu.memory_space<vmem>>, vector<1x1x32x32xf32>
    %235 = vector.shape_cast %234 : vector<1x1x32x32xf32> to vector<32x32xf32>
    %cst_118 = arith.constant dense<0.000000e+00> : vector<2x32xf32>
    %236 = tpu.matmul %233, %235, %cst_118 {dimension_numbers = #tpu.dot_dimension_numbers<[1], [0], [0], [1], [0, 0, 1, 1], [], []>} : vector<2x32xf32>, vector<32x32xf32>, vector<2x32xf32> -> vector<2x32xf32>
    %237 = vector.broadcast %200 : vector<1x32xf32> to vector<2x32xf32>
    %238 = arith.addf %236, %237 : vector<2x32xf32>
    %cst_119 = arith.constant 0.000000e+00 : f32
    %239 = vector.broadcast %cst_119 : f32 to vector<2x32xf32>
    %240 = arith.maximumf %238, %239 : vector<2x32xf32>
    %c1_120 = arith.constant 1 : index
    %c1_121 = arith.constant 1 : index
    %c0_122 = arith.constant 0 : index
    %c0_123 = arith.constant 0 : index
    %241 = vector.load %arg8[%c1_120, %c1_121, %c0_122, %c0_123] : memref<2x2x32x32xf32, #tpu.memory_space<vmem>>, vector<1x1x32x32xf32>
    %242 = vector.shape_cast %241 : vector<1x1x32x32xf32> to vector<32x32xf32>
    %cst_124 = arith.constant dense<0.000000e+00> : vector<2x32xf32>
    %243 = tpu.matmul %240, %242, %cst_124 {dimension_numbers = #tpu.dot_dimension_numbers<[1], [0], [0], [1], [0, 0, 1, 1], [], []>} : vector<2x32xf32>, vector<32x32xf32>, vector<2x32xf32> -> vector<2x32xf32>
    %244 = vector.broadcast %201 : vector<1x32xf32> to vector<2x32xf32>
    %245 = arith.addf %243, %244 : vector<2x32xf32>
    %246 = arith.addf %233, %245 : vector<2x32xf32>
    %cst_125 = arith.constant dense<0.000000e+00> : vector<2xf32>
    %247 = vector.multi_reduction <add>, %246, %cst_125 [1] : vector<2x32xf32> to vector<2xf32>
    %248 = vector.shape_cast %247 : vector<2xf32> to vector<2x1xf32>
    %cst_126 = arith.constant 3.200000e+01 : f32
    %249 = vector.broadcast %cst_126 : f32 to vector<2x1xf32>
    %250 = arith.divf %248, %249 : vector<2x1xf32>
    %251 = vector.broadcast %250 : vector<2x1xf32> to vector<2x32xf32>
    %252 = arith.subf %246, %251 : vector<2x32xf32>
    %253 = arith.mulf %252, %252 : vector<2x32xf32>
    %cst_127 = arith.constant dense<0.000000e+00> : vector<2xf32>
    %254 = vector.multi_reduction <add>, %253, %cst_127 [1] : vector<2x32xf32> to vector<2xf32>
    %255 = vector.shape_cast %254 : vector<2xf32> to vector<2x1xf32>
    %cst_128 = arith.constant 3.200000e+01 : f32
    %256 = vector.broadcast %cst_128 : f32 to vector<2x1xf32>
    %257 = arith.divf %255, %256 : vector<2x1xf32>
    %cst_129 = arith.constant 9.99999974E-6 : f32
    %258 = vector.broadcast %cst_129 : f32 to vector<2x1xf32>
    %259 = arith.addf %257, %258 : vector<2x1xf32>
    %260 = math.rsqrt %259 : vector<2x1xf32>
    %261 = vector.broadcast %250 : vector<2x1xf32> to vector<2x32xf32>
    %262 = arith.subf %246, %261 : vector<2x32xf32>
    %263 = vector.broadcast %260 : vector<2x1xf32> to vector<2x32xf32>
    %264 = arith.mulf %262, %263 : vector<2x32xf32>
    %265 = vector.broadcast %204 : vector<1x32xf32> to vector<2x32xf32>
    %266 = arith.mulf %264, %265 : vector<2x32xf32>
    %267 = vector.broadcast %205 : vector<1x32xf32> to vector<2x32xf32>
    %268 = arith.addf %266, %267 : vector<2x32xf32>
    %c1_130 = arith.constant 1 : index
    %c0_131 = arith.constant 0 : index
    %c0_132 = arith.constant 0 : index
    %269 = vector.load %arg10[%c1_130, %c0_131, %c0_132] : memref<2x2x32xf32, #tpu.memory_space<vmem>>, vector<1x2x32xf32>
    %270 = vector.shape_cast %269 : vector<1x2x32xf32> to vector<2x32xf32>
    %271 = vector.shape_cast %268 : vector<2x32xf32> to vector<1x2x32xf32>
    tpu.vector_store %arg10[%c1_130, %c0_131, %c0_132], %271 {strides = array<i32>} : memref<2x2x32xf32, #tpu.memory_space<vmem>>, vector<1x2x32xf32>,
    return
  }
}

</mosaic_0001>

<bundles_post_ra>
// kernel: tpu_custom_call.1
= control target key start
LH: loop header
LB: loop body
LE: loop exit
PB: predicated region body
PF: predicated region fallthrough
CT: control target
= control target key end

     0   :  { %15 = vsyncpa [#allocation3], 0  ;;  %s1400_s0 = inlined_call_operand.vmem [shape: f32[2,24], index: 0, kind: input, shape index: {}]   ;;  %s1401_s1 = inlined_call_operand.vmem [shape: f32[2,32], index: 1, kind: input, shape index: {}]   ;;  %s1402_s2 = inlined_call_operand.vmem [shape: f32[2,2,8,32], index: 2, kind: input, shape index: {}]   ;;  %s1403_s3 = inlined_call_operand.vmem [shape: f32[24,32], index: 3, kind: input, shape index: {}]   ;;  %s1404_s4 = inlined_call_operand.vmem [shape: f32[1,32], index: 4, kind: input, shape index: {}]   ;;  %s1405_s5 = inlined_call_operand.vmem [shape: f32[2,2,32,64], index: 5, kind: input, shape index: {}]   ;;  %s1406_s6 = inlined_call_operand.vmem [shape: f32[2,2,1,64], index: 6, kind: input, shape index: {}]   ;;  %s1407_s7 = inlined_call_operand.vmem [shape: f32[2,64,32], index: 7, kind: input, shape index: {}]   ;;  %s1408_s8 = inlined_call_operand.hbm [shape: f32[2,2,32,32], index: 8, kind: input, shape index: {}]   ;;  %s1409_s9 = inlined_call_operand.vmem [shape: f32[2,7,32], index: 9, kind: input, shape index: {}]   ;;  %s1410_s10 = inlined_call_operand.hbm [shape: f32[2,2,32], index: 10, kind: output, shape index: {}]  }
   0x1   :  { %16 = vsyncpa [#allocation4], 0  ;;  %s37_s15 = sshll.u32 %s1408_s8, 4  ;;  %s1024_s16 = smov [#allocation2]   ;;  %s38_s15 = int_to_ptr.hbm [resolvable:$true] %s37_s15 }
   0x2   :  { %s39_s17 = sshll.u32 %s1024_s16, 4  ;;  %s1025_s18 = smov 128   ;;  %s40_s17 = int_to_ptr.vmem [resolvable:$true] %s39_s17 }
   0x3   :  { %s1026_s19 = smov 8  }
   0x4   :  { %45 = dma.hbm_to_vmem [thread:$0]  %s38_s15, 2048, %s40_s17, [#allocation3], %s1025_s18, %s1025_s18, %s1026_s19  }
   0x5   :  { %1020 = dma.done.wait [#allocation3], 2048  }
   0x6   :  { %1021 = vsyncadd [#allocation3], 4294965248  ;;  %v110_v0 = vld [vmem:[%s1403_s3 + $0x10] sm:$0xff]  ;;  %v109_v1 = vld [vmem:[%s1403_s3 + $0x8] sm:$0xff]  ;;  %vm115_vm0 = vcmask 195584   ;;  %vm151_vm1 = vcmask 261120   ;;  %v52_v14 = vlaneseq }
   0x7   :  { %132 = vmatpush.msra.mxu0 %v110_v0  ;;  %v872_v2 = vld [vmem:[%s1405_s5 + $0x38] sm:$0xff]  ;;  %v871_v3 = vld [vmem:[%s1405_s5 + $0x30] sm:$0xff]  ;;  %v108_v4 = vld [vmem:[%s1403_s3] sm:$0xff]  ;;  %v1027_v25 = vmov 1.0   ;;  %s854_s17 = sshll.u32 %s1410_s10, 4  ;;  %s1031_s18 = smov 32   ;;  %s855_s17 = int_to_ptr.hbm [resolvable:$true] %s854_s17 }
   0x8   :  { %v107_v5 = vld [vmem:[%s1400_s0] sm:$0x3]  ;;  %203 = vmatpush.msra.mxu2 %v872_v2  ;;  %v870_v6 = vld [vmem:[%s1405_s5 + $0x28] sm:$0xff]  ;;  %v146_v7 = vld [vmem:[%s1405_s5 + $0x18] sm:$0xff]  ;;  %v1135_v15 = vshrl.u32 %v52_v14, 7  ;;  %v1137_v16 = vand.u32 127, %v52_v14 }
   0x9   :  { %133 = vmatpush.msra.mxu0 %v109_v1  ;;  %167 = vmatpush.msra.mxu1 %v146_v7  ;;  %v869_v8 = vld [vmem:[%s1405_s5 + $0x20] sm:$0xff]  ;;  %v145_v10 = vld [vmem:[%s1405_s5 + $0x10] sm:$0xff]  ;;  %v144_v11 = vld [vmem:[%s1405_s5 + $0x8] sm:$0xff]  ;;  %s1032_s19 = smov 2  }
   0xa   :  { %204 = vmatpush.msra.mxu2 %v871_v3  ;;  %v141_v9 = vld [vmem:[%s1402_s2] sm:$0xff]  ;;  %v142_v12 = vld [vmem:[%s1402_s2 + $0x8] sm:$0xff]  ;;  %v60_v17 = vadd.s32 56, %v1135_v15  ;;  %v63_v18 = vmul.u32 8, %v1137_v16  ;;  %v72_v19 = vadd.s32 1, %v1137_v16  ;;  %v59_v20 = vadd.s32 48, %v1135_v15 }
   0xb   :  { %134 = vmatpush.msra.mxu0 %v108_v4  ;;  %168 = vmatpush.msra.mxu1 %v145_v10  ;;  %v143_v13 = vld [vmem:[%s1405_s5] sm:$0xff]  ;;  %v58_v21 = vadd.s32 40, %v1135_v15  ;;  %v57_v23 = vadd.s32 32, %v1135_v15  ;;  %v56_v34 = vadd.s32 24, %v1135_v15  ;;  %v55_v35 = vadd.s32 16, %v1135_v15 }
   0xc   :  { %867 = vmatmul.msk.f32.vlgmr.msra.gmra.mxu0 %vm115_vm0, %v107_v5  ;;  %205 = vmatpush.msra.mxu2 %v870_v6  ;;  %vm71_vm2 = vcmp.ge.s32.totalorder %v60_v17, %v63_v18  ;;  %v73_v22 = vmul.u32 8, %v72_v19  ;;  %vm70_vm3 = vcmp.ge.s32.totalorder %v59_v20, %v63_v18  ;;  %v941_v29 = vld [vmem:[%s1404_s4] ss:$0 sm:$0xff]  ;;  %v54_v37 = vadd.s32 8, %v1135_v15  ;;  %v942_v39 = vld [vmem:[%s1406_s6 + $0x1] ss:$0 sm:$0xff] }
   0xd   :  { %169 = vmatpush.msra.mxu1 %v144_v11  ;;  %vm69_vm6 = vcmp.ge.s32.totalorder %v58_v21, %v63_v18  ;;  %vm68_vm10 = vcmp.ge.s32.totalorder %v57_v23, %v63_v18  ;;  %v139_v31 = vld [vmem:[%s1401_s1] sm:$0x3]  ;;  %vm67_vm14 = vcmp.ge.s32.totalorder %v56_v34, %v63_v18  ;;  %v101_v56 = vadd.s32 1, %v1135_v15 }
   0xe   :  { %206 = vmatpush.msra.mxu2 %v869_v8  ;;  %vm81_vm4 = vcmp.lt.s32.totalorder %v60_v17, %v73_v22  ;;  %vm80_vm5 = vcmp.lt.s32.totalorder %v59_v20, %v73_v22  ;;  %vm79_vm7 = vcmp.lt.s32.totalorder %v58_v21, %v73_v22  ;;  %vm78_vm11 = vcmp.lt.s32.totalorder %v57_v23, %v73_v22  ;;  %v943_v40 = vld [vmem:[%s1406_s6] ss:$0 sm:$0xff] }
   0xf   :  { %874 = vmatmul.msk.f32.vlgmr.msra.gmra.mxu2 %vm151_vm1, %v141_v9  ;;  %170 = vmatpush.msra.mxu1 %v143_v13  ;;  %vm1145_vm8 = vmand %vm71_vm2, %vm81_vm4  ;;  %vm77_vm15 = vcmp.lt.s32.totalorder %v56_v34, %v73_v22  ;;  %vm66_vm2 = vcmp.ge.s32.totalorder %v55_v35, %v63_v18  ;;  %v98_v59 = vmul.u32 8, %v1135_v15  ;;  %v102_v61 = vmul.u32 8, %v101_v56 }
  0x10   :  { %876 = vmatpush.msk.msra.mxu3 %vm1145_vm8, %v1027_v25  ;;  %vm1151_vm9 = vmand %vm70_vm3, %vm80_vm5  ;;  %vm76_vm3 = vcmp.lt.s32.totalorder %v55_v35, %v73_v22  ;;  %vm65_vm5 = vcmp.ge.s32.totalorder %v54_v37, %v63_v18  ;;  %v1028_v6 = vmov 0.0  }
  0x11   :  { %vm1155_vm12 = vmand %vm69_vm6, %vm79_vm7  ;;  %vm75_vm6 = vcmp.lt.s32.totalorder %v54_v37, %v73_v22  ;;  %v99_v63 = vadd.s32 32, %v98_v59  ;;  %v103_v1 = vadd.s32 32, %v102_v61  ;;  %v350_v37 = vld [vmem:[%s1407_s7 + $0x38] sm:$0xff] }
  0x12   :  { %877 = vmatpush.msk.msra.mxu3 %vm1151_vm9, %v1027_v25  ;;  %vm1161_vm13 = vmand %vm68_vm10, %vm78_vm11  ;;  %vm64_vm10 = vcmp.ge.s32.totalorder %v1135_v15, %v63_v18  ;;  %vm74_vm11 = vcmp.lt.s32.totalorder %v1135_v15, %v73_v22  ;;  %366 = vmatpush.msrb.mxu1 %v350_v37 }
  0x13   :  { %vm1181_vm0 = vmand %vm67_vm14, %vm77_vm15  ;;  %vm299_vm15 = vcmask 1043456  }
  0x14   :  { %878 = vmatpush.msk.msra.mxu3 %vm1155_vm12, %v1027_v25  ;;  %vm84_vm4 = vmand %vm66_vm2, %vm76_vm3  ;;  %vm354_vm2 = vcmask 1041409   ;;  %vm379_vm3 = vcmask 254976  }
  0x15   :  { %vm83_vm7 = vmand %vm65_vm5, %vm75_vm6 }
  0x16   :  { %879 = vmatpush.msk.msra.mxu3 %vm1161_vm13, %v1027_v25  ;;  %vm82_vm14 = vmand %vm64_vm10, %vm74_vm11 }
  0x17   :  { %875 = vmatmul.msk.f32.gmra.mxu2 %vm151_vm1, %v142_v12 }
  0x18   :  { %880 = vmatpush.msk.msra.mxu3 %vm1181_vm0, %v1027_v25 }
  0x1a   :  { %881 = vmatpush.msk.msra.mxu3 %vm84_vm4, %v1027_v25 }
  0x1c   :  { %882 = vmatpush.msk.msra.mxu3 %vm83_vm7, %v1027_v25 }
  0x1e   :  { %883 = vmatpush.msk.msra.mxu3 %vm82_vm14, %v1027_v25 }
  0x20   :  { %907 = vmatpush.msk.msrb.mxu3 %vm1145_vm8, %v1027_v25  ;;  %vm222_vm8 = vcmask 523264  }
  0x22   :  { %908 = vmatpush.msk.msrb.mxu3 %vm1151_vm9, %v1027_v25  ;;  %vm254_vm9 = vcmask 31744  }
  0x24   :  { %909 = vmatpush.msk.msrb.mxu3 %vm1155_vm12, %v1027_v25  ;;  %vm100_vm12 = vcmp.ge.s32.totalorder %v1137_v16, %v99_v63 }
  0x26   :  { %910 = vmatpush.msk.msrb.mxu3 %vm1161_vm13, %v1027_v25  ;;  %vm104_vm13 = vcmp.lt.s32.totalorder %v1137_v16, %v103_v1 }
  0x28   :  { %911 = vmatpush.msk.msrb.mxu3 %vm1181_vm0, %v1027_v25  ;;  %vm105_vm0 = vmand %vm100_vm12, %vm104_vm13 }
  0x29   :  { %v1220_v7 = vsel %vm105_vm0, 1.0, %v1028_v6  ;;  %v1029_v6 = vmov 32.0  }
  0x2a   :  { %912 = vmatpush.msk.msrb.mxu3 %vm84_vm4, %v1027_v25  ;;  %886 = vmatpush.msk.msrb.mxu0 %vm299_vm15, %v1220_v7 }
  0x2c   :  { %913 = vmatpush.msk.msrb.mxu3 %vm83_vm7, %v1027_v25 }
  0x2e   :  { %914 = vmatpush.msk.msrb.mxu3 %vm82_vm14, %v1027_v25 }
  0x89   :  { %v136_v30 = vpop.f32.mrf.mxu0 }
  0x8a   :  { %v137_v32 = vadd.f32 %v941_v29, %v136_v30 }
  0x8c   :  { %v1175_v33 = vadd.f32 %v139_v31, %v137_v32 }
  0x8e   :  { %868 = vmatmul.msk.f32.vlgmr.msra.gmra.mxu1 %vm151_vm1, %v1175_v33 }
  0x92   :  { %v208_v38 = vpop.f32.mrf.mxu2 }
  0x93   :  { %v1206_v42 = vadd.f32 %v942_v39, %v208_v38  ;;  %v349_v38 = vld [vmem:[%s1407_s7 + $0x30] sm:$0xff] }
  0x94   :  { %367 = vmatpush.msrb.mxu1 %v349_v38 }
  0x9a   :  { %v211_v47 = vpop.f32.mrf.mxu2 }
  0x9b   :  { %v1210_v49 = vadd.f32 %v942_v39, %v211_v47  ;;  %v348_v39 = vld [vmem:[%s1407_s7 + $0x28] sm:$0xff] }
  0x9c   :  { %368 = vmatpush.msrb.mxu1 %v348_v39 }
 0x10b   :  { %v172_v41 = vpop.f32.mrf.mxu1 }
 0x10c   :  { %v173_v43 = vadd.f32 %v943_v40, %v172_v41  ;;  %v347_v40 = vld [vmem:[%s1407_s7 + $0x20] sm:$0xff]  ;;  %v346_v41 = vld [vmem:[%s1407_s7 + $0x18] sm:$0xff] }
 0x10d   :  { %369 = vmatpush.msrb.mxu1 %v347_v40 }
 0x10e   :  { %v216_v44 = vperm.slane %v173_v43, 0  ;;  %v215_v45 = vrot.slane %v173_v43, 1  ;;  %v345_v43 = vld [vmem:[%s1407_s7 + $0x10] sm:$0xff] }
 0x10f   :  { %370 = vmatpush.msrb.mxu1 %v346_v41  ;;  %v443_v41 = vld [vmem:[#allocation2 + $0x20] sm:$0xff] }
 0x110   :  { %v220_v46 = vmul.f32 %v216_v44, %v1206_v42  ;;  %v217_v48 = vperm.slane %v215_v45, 0  ;;  %v344_v44 = vld [vmem:[%s1407_s7 + $0x8] sm:$0xff]  ;;  %v343_v45 = vld [vmem:[%s1407_s7] sm:$0xff] }
 0x111   :  { %371 = vmatpush.msrb.mxu1 %v345_v43 }
 0x112   :  { %884 = vmatmul.msk.f32.vlgmr.msra.gmra.mxu3 %vm222_vm8, %v220_v46  ;;  %v221_v50 = vmul.f32 %v217_v48, %v1210_v49 }
 0x113   :  { %372 = vmatpush.msrb.mxu1 %v344_v44 }
 0x115   :  { %373 = vmatpush.msrb.mxu1 %v343_v45 }
 0x11a   :  { %885 = vmatmul.msk.f32.gmra.mxu3 %vm222_vm8, %v221_v50 }
 0x195   :  { %v246_v51 = vpop.f32.mrf.mxu3 }
 0x196   :  { %v252_v52 = vmul.f32 0.35355338, %v246_v51 }
 0x198   :  { %v255_v53 = vsel %vm254_vm9, %v252_v52, -inf }
 0x199   :  { %v256_v54 = vrot.slane %v255_v53, 4 }
 0x19b   :  { %v257_v55 = vmax.f32 %v255_v53, %v256_v54 }
 0x19d   :  { %v258_v57 = vrot.slane %v257_v55, 2  ;;  %v249_v58 = vpop.f32.mrf.mxu3 }
 0x19e   :  { %v253_v60 = vmul.f32 0.35355338, %v249_v58 }
 0x19f   :  { %v259_v62 = vmax.f32 %v257_v55, %v258_v57 }
 0x1a0   :  { %v262_v0 = vsel %vm254_vm9, %v253_v60, -inf }
 0x1a1   :  { %v260_v2 = vrot.slane %v259_v62, 1  ;;  %v263_v3 = vrot.slane %v262_v0, 4 }
 0x1a3   :  { %v261_v4 = vmax.f32 %v259_v62, %v260_v2  ;;  %v264_v5 = vmax.f32 %v262_v0, %v263_v3 }
 0x1a5   :  { %v269_v8 = vsub.f32 %v252_v52, %v261_v4  ;;  %v265_v9 = vrot.slane %v264_v5, 2 }
 0x1a7   :  { %v271_v10 = vmul.f32 1.442695, %v269_v8  ;;  %v266_v11 = vmax.f32 %v264_v5, %v265_v9 }
 0x1a9   :  { %946 = vpow2.f32 %v271_v10  ;;  %v267_v12 = vrot.slane %v266_v11, 1 }
 0x1ab   :  { %v268_v13 = vmax.f32 %v266_v11, %v267_v12 }
 0x1ad   :  { %v270_v14 = vsub.f32 %v253_v60, %v268_v13 }
 0x1af   :  { %v947_v15 = vpop.eup %946  ;;  %v273_v16 = vmul.f32 1.442695, %v270_v14 }
 0x1b0   :  { %v275_v17 = vsel %vm254_vm9, %v947_v15, 0.0 }
 0x1b1   :  { %v276_v18 = vrot.slane %v275_v17, 4  ;;  %948 = vpow2.f32 %v273_v16 }
 0x1b3   :  { %v277_v19 = vadd.f32 %v276_v18, %v275_v17  ;;  %v416_v18 = vld [vmem:[#allocation2 + $0x18] sm:$0xff] }
 0x1b4   :  { %433 = vmatpush.msrb.mxu2 %v416_v18 }
 0x1b5   :  { %v278_v20 = vrot.slane %v277_v19, 2 }
 0x1b7   :  { %v949_v21 = vpop.eup %948  ;;  %v279_v22 = vadd.f32 %v278_v20, %v277_v19  ;;  %v415_v19 = vld [vmem:[#allocation2 + $0x10] sm:$0xff]  ;;  %v414_v20 = vld [vmem:[#allocation2 + $0x8] sm:$0xff] }
 0x1b8   :  { %v282_v23 = vsel %vm254_vm9, %v949_v21, 0.0  ;;  %434 = vmatpush.msrb.mxu2 %v415_v19  ;;  %v944_v19 = vld [vmem:[%s1406_s6 + $0x3] ss:$0 sm:$0xff] }
 0x1b9   :  { %v280_v24 = vrot.slane %v279_v22, 1  ;;  %v283_v25 = vrot.slane %v282_v23, 4 }
 0x1ba   :  { %435 = vmatpush.msrb.mxu2 %v414_v20  ;;  %v945_v20 = vld [vmem:[%s1406_s6 + $0x2] ss:$0 sm:$0xff] }
 0x1bb   :  { %v284_v26 = vadd.f32 %v283_v25, %v282_v23  ;;  %v281_v27 = vadd.f32 %v280_v24, %v279_v22  ;;  %v446_v22 = vld [vmem:[#allocation2 + $0x38] sm:$0xff]  ;;  %v445_v23 = vld [vmem:[#allocation2 + $0x30] sm:$0xff]  ;;  %v444_v24 = vld [vmem:[#allocation2 + $0x28] sm:$0xff] }
 0x1bc   :  { %463 = vmatpush.msra.mxu0 %v446_v22 }
 0x1bd   :  { %v285_v28 = vrot.slane %v284_v26, 2  ;;  %950 = vrcp.f32 %v281_v27 }
 0x1be   :  { %464 = vmatpush.msra.mxu0 %v445_v23 }
 0x1bf   :  { %v286_v29 = vadd.f32 %v285_v28, %v284_v26 }
 0x1c0   :  { %465 = vmatpush.msra.mxu0 %v444_v24 }
 0x1c1   :  { %v287_v30 = vrot.slane %v286_v29, 1 }
 0x1c2   :  { %466 = vmatpush.msra.mxu0 %v443_v41 }
 0x1c3   :  { %v951_v31 = vpop.eup %950  ;;  %v288_v32 = vadd.f32 %v287_v30, %v286_v29 }
 0x1c4   :  { %v291_v34 = vmul.f32 %v951_v31, %v947_v15 }
 0x1c5   :  { %952 = vrcp.f32 %v288_v32 }
 0x1c6   :  { %887 = vmatmul.msk.f32.vlgmr.msrb.gmra.mxu0 %vm254_vm9, %v291_v34  ;;  %954 = vrcp.f32 %v1029_v6 }
 0x1c7   :  { %917 = vmatpush.msk.msrb.mxu0 %vm299_vm15, %v1220_v7 }
 0x1cb   :  { %v953_v35 = vpop.eup %952 }
 0x1cc   :  { %v292_v36 = vmul.f32 %v953_v35, %v949_v21  ;;  %v955_v8 = vpop.eup %954  ;;  %v413_v21 = vld [vmem:[#allocation2] sm:$0xff] }
 0x1cd   :  { %v384_v9 = vmul.f32 32.0, %v955_v8  ;;  %vm388_vm4 = vweird.f32 %v955_v8  ;;  %436 = vmatpush.msrb.mxu2 %v413_v21 }
 0x1ce   :  { %888 = vmatmul.msk.f32.gmra.mxu0 %vm254_vm9, %v292_v36 }
 0x1cf   :  { %v385_v10 = vsub.f32 1.0, %v384_v9 }
 0x1d1   :  { %v386_v11 = vmul.f32 %v955_v8, %v385_v10 }
 0x1d3   :  { %v387_v12 = vadd.f32 %v955_v8, %v386_v11 }
 0x1d5   :  { %v1266_v13 = vsel %vm388_vm4, %v955_v8, %v387_v12 }
 0x243   :  { %v320_v46 = vpop.f32.mrf.mxu0 }
 0x244   :  { %v326_v47 = vmul.f32 %v320_v46, %v1206_v42 }
 0x246   :  { %v328_v48 = vsel %vm222_vm8, %v326_v47, 0.0 }
 0x247   :  { %v329_v50 = vrot.slane %v328_v48, 4 }
 0x249   :  { %v330_v51 = vadd.f32 %v329_v50, %v328_v48 }
 0x24b   :  { %v323_v52 = vpop.f32.mrf.mxu0  ;;  %v331_v54 = vrot.slane %v330_v51, 2 }
 0x24c   :  { %v327_v53 = vmul.f32 %v323_v52, %v1210_v49  ;;  %v1261_v49 = vld [vmem:[%s1409_s9] sm:$0x7f] }
 0x24d   :  { %v332_v57 = vadd.f32 %v331_v54, %v330_v51  ;;  %v351_v1 = vperm.slane %v1261_v49, 0  ;;  %v409_v35 = vperm.slane %v1261_v49, 3  ;;  %v411_v38 = vperm.slane %v1261_v49, 4 }
 0x24e   :  { %v335_v55 = vsel %vm222_vm8, %v327_v53, 0.0  ;;  %v417_v43 = vperm.slane %v1261_v49, 1  ;;  %v447_v47 = vperm.slane %v1261_v49, 2  ;;  %v494_v12 = vperm.slane %v1261_v49, 5 }
 0x24f   :  { %v336_v56 = vrot.slane %v335_v55, 4  ;;  %v333_v60 = vrot.slane %v332_v57, 1 }
 0x251   :  { %v337_v58 = vadd.f32 %v336_v56, %v335_v55  ;;  %v334_v63 = vadd.f32 %v333_v60, %v332_v57  ;;  %v903_v57 = vld [vmem:[%s1405_s5 + $0x78] sm:$0xff]  ;;  %v900_v60 = vld [vmem:[%s1405_s5 + $0x60] sm:$0xff] }
 0x252   :  { %563 = vmatpush.msra.mxu2 %v903_v57 }
 0x253   :  { %v338_v59 = vrot.slane %v337_v58, 2 }
 0x255   :  { %v339_v61 = vadd.f32 %v338_v59, %v337_v58  ;;  %v902_v58 = vld [vmem:[%s1405_s5 + $0x70] sm:$0xff]  ;;  %v901_v59 = vld [vmem:[%s1405_s5 + $0x68] sm:$0xff] }
 0x256   :  { %564 = vmatpush.msra.mxu2 %v902_v58 }
 0x257   :  { %v340_v62 = vrot.slane %v339_v61, 1 }
 0x258   :  { %565 = vmatpush.msra.mxu2 %v901_v59 }
 0x259   :  { %v341_v42 = vadd.f32 %v340_v62, %v339_v61  ;;  %v892_v61 = vld [vmem:[%s1402_s2 + $0x10] sm:$0xff]  ;;  %v897_v62 = vld [vmem:[%s1405_s5 + $0x58] sm:$0xff] }
 0x25a   :  { %566 = vmatpush.msra.mxu2 %v900_v60  ;;  %527 = vmatpush.msra.mxu1 %v897_v62 }
 0x25b   :  { %v355_v0 = vsel %vm354_vm2, %v341_v42, %v334_v63  ;;  %v896_v63 = vld [vmem:[%s1405_s5 + $0x50] sm:$0xff]  ;;  %v895_v42 = vld [vmem:[%s1405_s5 + $0x48] sm:$0xff] }
 0x25c   :  { %889 = vmatmul.msk.f32.vlgmr.msrb.gmra.mxu1 %vm222_vm8, %v355_v0  ;;  %v894_v0 = vld [vmem:[%s1405_s5 + $0x40] sm:$0xff] }
 0x25d   :  { %528 = vmatpush.msra.mxu1 %v896_v63 }
 0x25f   :  { %529 = vmatpush.msra.mxu1 %v895_v42 }
 0x261   :  { %530 = vmatpush.msra.mxu1 %v894_v0 }
 0x2d9   :  { %v375_v2 = vpop.f32.mrf.mxu1 }
 0x2da   :  { %v376_v3 = vadd.f32 %v375_v2, %v351_v1  ;;  %v893_v1 = vld [vmem:[%s1402_s2 + $0x18] sm:$0xff] }
 0x2dc   :  { %v378_v4 = vadd.f32 %v376_v3, %v1175_v33 }
 0x2de   :  { %v380_v5 = vsel %vm379_vm3, %v378_v4, 0.0 }
 0x2df   :  { %381 = vadd.xlane.f32.xlu0 %v380_v5 }
 0x352   :  { %v382_v14 = vpop.xlane.xlu0 %381 }
 0x353   :  { %v390_v15 = vmul.f32 %v1266_v13, %v382_v14 }
 0x355   :  { %v391_v16 = vsub.f32 %v378_v4, %v390_v15 }
 0x357   :  { %v392_v17 = vmul.f32 %v391_v16, %v391_v16 }
 0x359   :  { %v393_v33 = vsel %vm379_vm3, %v392_v17, 0.0 }
 0x35a   :  { %394 = vadd.xlane.f32.xlu0 %v393_v33 }
 0x3cd   :  { %v395_v25 = vpop.xlane.xlu0 %394 }
 0x3ce   :  { %v396_v26 = vmul.f32 %v395_v25, %v1266_v13 }
 0x3d0   :  { %v397_v27 = vadd.f32 1e-05, %v396_v26 }
 0x3d2   :  { %956 = vrsqrt.f32 %v397_v27  ;;  %vm404_vm6 = vweird.f32 %v397_v27 }
 0x3d8   :  { %v957_v28 = vpop.eup %956 }
 0x3d9   :  { %v399_v29 = vmul.f32 %v957_v28, %v397_v27  ;;  %vm405_vm5 = vweird.f32 %v957_v28 }
 0x3da   :  { %vm406_vm7 = vmor %vm404_vm6, %vm405_vm5 }
 0x3db   :  { %v400_v30 = vmul.f32 %v957_v28, %v399_v29 }
 0x3dd   :  { %v401_v31 = vmul.f32 0.5, %v400_v30 }
 0x3df   :  { %v402_v32 = vsub.f32 1.5, %v401_v31 }
 0x3e1   :  { %v403_v34 = vmul.f32 %v957_v28, %v402_v32 }
 0x3e3   :  { %v407_v36 = vsel %vm406_vm7, %v957_v28, %v403_v34 }
 0x3e4   :  { %v408_v37 = vmul.f32 %v407_v36, %v391_v16  ;;  %v496_v16 = vperm.slane %v1261_v49, 6 }
 0x3e6   :  { %v410_v39 = vmul.f32 %v409_v35, %v408_v37 }
 0x3e8   :  { %v412_v40 = vadd.f32 %v411_v38, %v410_v39 }
 0x3ea   :  { %890 = vmatmul.msk.f32.vlgmr.msrb.gmra.mxu2 %vm151_vm1, %v412_v40 }
 0x3f2   :  { %905 = vmatmul.msk.f32.vlgmr.msra.gmra.mxu2 %vm151_vm1, %v892_v61 }
 0x3fa   :  { %906 = vmatmul.msk.f32.gmra.mxu2 %vm151_vm1, %v893_v1 }
 0x46d   :  { %v438_v44 = vpop.f32.mrf.mxu2 }
 0x46e   :  { %v439_v45 = vadd.f32 %v438_v44, %v417_v43 }
 0x470   :  { %v441_v46 = vmax.f32 %v439_v45, 0.0 }
 0x472   :  { %891 = vmatmul.msk.f32.vlgmr.msra.gmra.mxu0 %vm151_vm1, %v441_v46 }
 0x475   :  { %v568_v18 = vpop.f32.mrf.mxu2 }
 0x476   :  { %v1329_v49 = vadd.f32 %v944_v19, %v568_v18  ;;  %v921_v18 = vld [vmem:[%s1407_s7 + $0x40] sm:$0xff] }
 0x47d   :  { %v571_v26 = vpop.f32.mrf.mxu2 }
 0x47e   :  { %v1333_v28 = vadd.f32 %v944_v19, %v571_v26 }
 0x4ef   :  { %v468_v48 = vpop.f32.mrf.mxu0 }
 0x4f0   :  { %v469_v50 = vadd.f32 %v468_v48, %v447_v47 }
 0x4f2   :  { %v471_v51 = vadd.f32 %v469_v50, %v412_v40 }
 0x4f4   :  { %v472_v52 = vsel %vm379_vm3, %v471_v51, 0.0 }
 0x4f5   :  { %473 = vadd.xlane.f32.xlu1 %v472_v52 }
 0x568   :  { %v474_v53 = vpop.xlane.xlu1 %473 }
 0x569   :  { %v475_v54 = vmul.f32 %v474_v53, %v1266_v13 }
 0x56b   :  { %v476_v55 = vsub.f32 %v471_v51, %v475_v54 }
 0x56d   :  { %v477_v7 = vmul.f32 %v476_v55, %v476_v55 }
 0x56f   :  { %v478_v56 = vsel %vm379_vm3, %v477_v7, 0.0 }
 0x570   :  { %479 = vadd.xlane.f32.xlu1 %v478_v56 }
 0x5e3   :  { %v480_v2 = vpop.xlane.xlu1 %479 }
 0x5e4   :  { %v481_v3 = vmul.f32 %v480_v2, %v1266_v13 }
 0x5e6   :  { %v482_v4 = vadd.f32 1e-05, %v481_v3 }
 0x5e8   :  { %958 = vrsqrt.f32 %v482_v4  ;;  %vm489_vm11 = vweird.f32 %v482_v4 }
 0x5ee   :  { %v959_v5 = vpop.eup %958 }
 0x5ef   :  { %v484_v6 = vmul.f32 %v959_v5, %v482_v4  ;;  %vm490_vm10 = vweird.f32 %v959_v5 }
 0x5f0   :  { %vm491_vm14 = vmor %vm489_vm11, %vm490_vm10 }
 0x5f1   :  { %v485_v8 = vmul.f32 %v959_v5, %v484_v6 }
 0x5f3   :  { %v486_v9 = vmul.f32 0.5, %v485_v8 }
 0x5f5   :  { %v487_v10 = vsub.f32 1.5, %v486_v9 }
 0x5f7   :  { %v488_v11 = vmul.f32 %v959_v5, %v487_v10  ;;  %v928_v10 = vld [vmem:[%s1407_s7 + $0x78] sm:$0xff] }
 0x5f8   :  { %721 = vmatpush.msrb.mxu1 %v928_v10 }
 0x5f9   :  { %v492_v14 = vsel %vm491_vm14, %v959_v5, %v488_v11  ;;  %v927_v11 = vld [vmem:[%s1407_s7 + $0x70] sm:$0xff] }
 0x5fa   :  { %v493_v15 = vmul.f32 %v492_v14, %v476_v55  ;;  %722 = vmatpush.msrb.mxu1 %v927_v11  ;;  %v925_v14 = vld [vmem:[%s1407_s7 + $0x60] sm:$0xff] }
 0x5fc   :  { %v495_v17 = vmul.f32 %v494_v12, %v493_v15  ;;  %v926_v12 = vld [vmem:[%s1407_s7 + $0x68] sm:$0xff]  ;;  %v924_v15 = vld [vmem:[%s1407_s7 + $0x58] sm:$0xff] }
 0x5fd   :  { %723 = vmatpush.msrb.mxu1 %v926_v12 }
 0x5fe   :  { %v1317_v33 = vadd.f32 %v496_v16, %v495_v17  ;;  %v923_v16 = vld [vmem:[%s1407_s7 + $0x50] sm:$0xff]  ;;  %v922_v17 = vld [vmem:[%s1407_s7 + $0x48] sm:$0xff] }
 0x5ff   :  { %724 = vmatpush.msrb.mxu1 %v925_v14 }
 0x600   :  { %899 = vmatmul.msk.f32.vlgmr.msra.gmra.mxu1 %vm151_vm1, %v1317_v33  ;;  %498 = vst.msk [vmem:[#allocation5] sm:$0x3] %vm379_vm3, %v1317_v33 }
 0x601   :  { %725 = vmatpush.msrb.mxu1 %v924_v15 }
 0x603   :  { %726 = vmatpush.msrb.mxu1 %v923_v16 }
 0x605   :  { %727 = vmatpush.msrb.mxu1 %v922_v17 }
 0x607   :  { %728 = vmatpush.msrb.mxu1 %v921_v18 }
 0x67d   :  { %v532_v21 = vpop.f32.mrf.mxu1 }
 0x67e   :  { %v533_v22 = vadd.f32 %v945_v20, %v532_v21 }
 0x680   :  { %v576_v23 = vperm.slane %v533_v22, 0  ;;  %v575_v24 = vrot.slane %v533_v22, 1 }
 0x682   :  { %v580_v25 = vmul.f32 %v576_v23, %v1329_v49  ;;  %v577_v27 = vperm.slane %v575_v24, 0 }
 0x684   :  { %915 = vmatmul.msk.f32.vlgmr.msrb.gmra.mxu3 %vm222_vm8, %v580_v25  ;;  %v581_v29 = vmul.f32 %v577_v27, %v1333_v28 }
 0x68c   :  { %916 = vmatmul.msk.f32.gmra.mxu3 %vm222_vm8, %v581_v29 }
 0x707   :  { %v605_v30 = vpop.f32.mrf.mxu3 }
 0x708   :  { %v611_v31 = vmul.f32 0.35355338, %v605_v30 }
 0x70a   :  { %v613_v32 = vsel %vm254_vm9, %v611_v31, -inf }
 0x70b   :  { %v614_v34 = vrot.slane %v613_v32, 4 }
 0x70d   :  { %v615_v35 = vmax.f32 %v613_v32, %v614_v34 }
 0x70f   :  { %v616_v36 = vrot.slane %v615_v35, 2  ;;  %v608_v37 = vpop.f32.mrf.mxu3 }
 0x710   :  { %v612_v38 = vmul.f32 0.35355338, %v608_v37 }
 0x711   :  { %v617_v39 = vmax.f32 %v615_v35, %v616_v36 }
 0x712   :  { %v620_v40 = vsel %vm254_vm9, %v612_v38, -inf }
 0x713   :  { %v618_v41 = vrot.slane %v617_v39, 1  ;;  %v621_v43 = vrot.slane %v620_v40, 4 }
 0x715   :  { %v619_v44 = vmax.f32 %v617_v39, %v618_v41  ;;  %v622_v45 = vmax.f32 %v620_v40, %v621_v43 }
 0x717   :  { %v627_v46 = vsub.f32 %v611_v31, %v619_v44  ;;  %v623_v47 = vrot.slane %v622_v45, 2 }
 0x719   :  { %v629_v48 = vmul.f32 1.442695, %v627_v46  ;;  %v624_v50 = vmax.f32 %v622_v45, %v623_v47 }
 0x71b   :  { %960 = vpow2.f32 %v629_v48  ;;  %v625_v51 = vrot.slane %v624_v50, 1 }
 0x71d   :  { %v626_v52 = vmax.f32 %v624_v50, %v625_v51  ;;  %v764_v51 = vld [vmem:[#allocation2 + $0x58] sm:$0xff] }
 0x71e   :  { %781 = vmatpush.msrb.mxu2 %v764_v51 }
 0x71f   :  { %v628_v53 = vsub.f32 %v612_v38, %v626_v52  ;;  %v763_v52 = vld [vmem:[#allocation2 + $0x50] sm:$0xff] }
 0x720   :  { %782 = vmatpush.msrb.mxu2 %v763_v52 }
 0x721   :  { %v961_v54 = vpop.eup %960  ;;  %v631_v55 = vmul.f32 1.442695, %v628_v53  ;;  %v762_v53 = vld [vmem:[#allocation2 + $0x48] sm:$0xff] }
 0x722   :  { %v633_v7 = vsel %vm254_vm9, %v961_v54, 0.0  ;;  %783 = vmatpush.msrb.mxu2 %v762_v53 }
 0x723   :  { %v634_v56 = vrot.slane %v633_v7, 4  ;;  %962 = vpow2.f32 %v631_v55  ;;  %v793_v55 = vld [vmem:[#allocation2 + $0x70] sm:$0xff] }
 0x725   :  { %v635_v57 = vadd.f32 %v634_v56, %v633_v7  ;;  %v792_v7 = vld [vmem:[#allocation2 + $0x68] sm:$0xff] }
 0x727   :  { %v636_v58 = vrot.slane %v635_v57, 2 }
 0x729   :  { %v963_v59 = vpop.eup %962  ;;  %v637_v60 = vadd.f32 %v636_v58, %v635_v57 }
 0x72a   :  { %v640_v61 = vsel %vm254_vm9, %v963_v59, 0.0 }
 0x72b   :  { %v638_v62 = vrot.slane %v637_v60, 1  ;;  %v641_v63 = vrot.slane %v640_v61, 4 }
 0x72d   :  { %v639_v42 = vadd.f32 %v638_v62, %v637_v60  ;;  %v642_v0 = vadd.f32 %v641_v63, %v640_v61 }
 0x72f   :  { %964 = vrcp.f32 %v639_v42  ;;  %v643_v1 = vrot.slane %v642_v0, 2 }
 0x731   :  { %v644_v2 = vadd.f32 %v643_v1, %v642_v0 }
 0x733   :  { %v645_v3 = vrot.slane %v644_v2, 1 }
 0x735   :  { %v965_v4 = vpop.eup %964  ;;  %v646_v5 = vadd.f32 %v645_v3, %v644_v2 }
 0x736   :  { %v649_v6 = vmul.f32 %v965_v4, %v961_v54  ;;  %v761_v54 = vld [vmem:[#allocation2 + $0x40] sm:$0xff] }
 0x737   :  { %966 = vrcp.f32 %v646_v5  ;;  %784 = vmatpush.msrb.mxu2 %v761_v54 }
 0x738   :  { %918 = vmatmul.msk.f32.vlgmr.msrb.gmra.mxu0 %vm254_vm9, %v649_v6  ;;  %v791_v6 = vld [vmem:[#allocation2 + $0x60] sm:$0xff] }
 0x73d   :  { %v967_v8 = vpop.eup %966 }
 0x73e   :  { %v650_v9 = vmul.f32 %v967_v8, %v963_v59 }
 0x740   :  { %919 = vmatmul.msk.f32.gmra.mxu0 %vm254_vm9, %v650_v9 }
 0x7b5   :  { %v674_v19 = vpop.f32.mrf.mxu0 }
 0x7b6   :  { %v680_v20 = vmul.f32 %v674_v19, %v1329_v49 }
 0x7b8   :  { %v682_v21 = vsel %vm222_vm8, %v680_v20, 0.0 }
 0x7b9   :  { %v683_v22 = vrot.slane %v682_v21, 4 }
 0x7bb   :  { %v684_v23 = vadd.f32 %v683_v22, %v682_v21 }
 0x7bd   :  { %v677_v24 = vpop.f32.mrf.mxu0  ;;  %v685_v26 = vrot.slane %v684_v23, 2 }
 0x7be   :  { %v681_v25 = vmul.f32 %v677_v24, %v1333_v28  ;;  %v1376_v28 = vld [vmem:[%s1409_s9 + $0x8] sm:$0x7f]  ;;  %s1030_s9 = smov [#allocation5]  }
 0x7bf   :  { %v686_v30 = vadd.f32 %v685_v26, %v684_v23  ;;  %v707_v39 = vperm.slane %v1376_v28, 0  ;;  %v756_v0 = vperm.slane %v1376_v28, 3  ;;  %v758_v3 = vperm.slane %v1376_v28, 4  ;;  %s852_s3 = sshll.u32 %s1030_s9, 4  ;;  %s853_s3 = int_to_ptr.vmem [resolvable:$true] %s852_s3 }
 0x7c0   :  { %v689_v27 = vsel %vm222_vm8, %v681_v25, 0.0  ;;  %v765_v8 = vperm.slane %v1376_v28, 1  ;;  %v795_v12 = vperm.slane %v1376_v28, 2 }
 0x7c1   :  { %v690_v29 = vrot.slane %v689_v27, 4  ;;  %v687_v34 = vrot.slane %v686_v30, 1 }
 0x7c3   :  { %v691_v31 = vadd.f32 %v690_v29, %v689_v27  ;;  %v688_v37 = vadd.f32 %v687_v34, %v686_v30  ;;  %v842_v34 = vperm.slane %v1376_v28, 5 }
 0x7c5   :  { %v692_v32 = vrot.slane %v691_v31, 2 }
 0x7c7   :  { %v693_v35 = vadd.f32 %v692_v32, %v691_v31 }
 0x7c9   :  { %v694_v36 = vrot.slane %v693_v35, 1 }
 0x7cb   :  { %v695_v38 = vadd.f32 %v694_v36, %v693_v35  ;;  %v844_v36 = vperm.slane %v1376_v28, 6 }
 0x7cd   :  { %v710_v49 = vsel %vm354_vm2, %v695_v38, %v688_v37 }
 0x7ce   :  { %929 = vmatmul.msk.f32.vlgmr.msrb.gmra.mxu1 %vm222_vm8, %v710_v49 }
 0x84b   :  { %v730_v40 = vpop.f32.mrf.mxu1 }
 0x84c   :  { %v731_v41 = vadd.f32 %v730_v40, %v707_v39 }
 0x84e   :  { %v733_v43 = vadd.f32 %v731_v41, %v1317_v33  ;;  %v794_v33 = vld [vmem:[#allocation2 + $0x78] sm:$0xff] }
 0x84f   :  { %811 = vmatpush.msra.mxu3 %v794_v33 }
 0x850   :  { %v734_v44 = vsel %vm379_vm3, %v733_v43, 0.0 }
 0x851   :  { %735 = vadd.xlane.f32.xlu2 %v734_v44  ;;  %812 = vmatpush.msra.mxu3 %v793_v55 }
 0x853   :  { %813 = vmatpush.msra.mxu3 %v792_v7 }
 0x855   :  { %814 = vmatpush.msra.mxu3 %v791_v6 }
 0x8c4   :  { %v736_v45 = vpop.xlane.xlu2 %735 }
 0x8c5   :  { %v737_v46 = vmul.f32 %v736_v45, %v1266_v13 }
 0x8c7   :  { %v738_v47 = vsub.f32 %v733_v43, %v737_v46 }
 0x8c9   :  { %v739_v48 = vmul.f32 %v738_v47, %v738_v47 }
 0x8cb   :  { %v740_v50 = vsel %vm379_vm3, %v739_v48, 0.0 }
 0x8cc   :  { %741 = vadd.xlane.f32.xlu2 %v740_v50 }
 0x93f   :  { %v742_v56 = vpop.xlane.xlu2 %741 }
 0x940   :  { %v743_v57 = vmul.f32 %v742_v56, %v1266_v13 }
 0x942   :  { %v744_v58 = vadd.f32 1e-05, %v743_v57 }
 0x944   :  { %968 = vrsqrt.f32 %v744_v58  ;;  %vm751_vm9 = vweird.f32 %v744_v58 }
 0x94a   :  { %v969_v59 = vpop.eup %968 }
 0x94b   :  { %v746_v60 = vmul.f32 %v969_v59, %v744_v58  ;;  %vm752_vm8 = vweird.f32 %v969_v59 }
 0x94c   :  { %vm753_vm12 = vmor %vm751_vm9, %vm752_vm8 }
 0x94d   :  { %v747_v61 = vmul.f32 %v969_v59, %v746_v60 }
 0x94f   :  { %v748_v62 = vmul.f32 0.5, %v747_v61 }
 0x951   :  { %v749_v63 = vsub.f32 1.5, %v748_v62 }
 0x953   :  { %v750_v42 = vmul.f32 %v969_v59, %v749_v63 }
 0x955   :  { %v754_v1 = vsel %vm753_vm12, %v969_v59, %v750_v42 }
 0x956   :  { %v755_v2 = vmul.f32 %v754_v1, %v738_v47 }
 0x958   :  { %v757_v4 = vmul.f32 %v756_v0, %v755_v2 }
 0x95a   :  { %v759_v5 = vadd.f32 %v758_v3, %v757_v4 }
 0x95c   :  { %930 = vmatmul.msk.f32.vlgmr.msrb.gmra.mxu2 %vm151_vm1, %v759_v5 }
 0x9df   :  { %v786_v9 = vpop.f32.mrf.mxu2 }
 0x9e0   :  { %v787_v10 = vadd.f32 %v786_v9, %v765_v8 }
 0x9e2   :  { %v789_v11 = vmax.f32 %v787_v10, 0.0 }
 0x9e4   :  { %931 = vmatmul.msk.f32.vlgmr.msra.gmra.mxu3 %vm151_vm1, %v789_v11 }
 0xa67   :  { %v816_v14 = vpop.f32.mrf.mxu3 }
 0xa68   :  { %v817_v15 = vadd.f32 %v816_v14, %v795_v12 }
 0xa6a   :  { %v819_v16 = vadd.f32 %v817_v15, %v759_v5 }
 0xa6c   :  { %v820_v17 = vsel %vm379_vm3, %v819_v16, 0.0 }
 0xa6d   :  { %821 = vadd.xlane.f32.xlu0 %v820_v17 }
 0xae0   :  { %v822_v18 = vpop.xlane.xlu0 %821 }
 0xae1   :  { %v823_v19 = vmul.f32 %v822_v18, %v1266_v13 }
 0xae3   :  { %v824_v20 = vsub.f32 %v819_v16, %v823_v19 }
 0xae5   :  { %v825_v21 = vmul.f32 %v824_v20, %v824_v20 }
 0xae7   :  { %v826_v22 = vsel %vm379_vm3, %v825_v21, 0.0 }
 0xae8   :  { %827 = vadd.xlane.f32.xlu1 %v826_v22 }
 0xb5b   :  { %v828_v23 = vpop.xlane.xlu1 %827 }
 0xb5c   :  { %v829_v24 = vmul.f32 %v828_v23, %v1266_v13 }
 0xb5e   :  { %v830_v25 = vadd.f32 1e-05, %v829_v24 }
 0xb60   :  { %970 = vrsqrt.f32 %v830_v25  ;;  %vm837_vm13 = vweird.f32 %v830_v25 }
 0xb66   :  { %v971_v26 = vpop.eup %970 }
 0xb67   :  { %v832_v27 = vmul.f32 %v971_v26, %v830_v25  ;;  %vm838_vm1 = vweird.f32 %v971_v26 }
 0xb68   :  { %vm839_vm15 = vmor %vm837_vm13, %vm838_vm1 }
 0xb69   :  { %v833_v29 = vmul.f32 %v971_v26, %v832_v27 }
 0xb6b   :  { %v834_v30 = vmul.f32 0.5, %v833_v29 }
 0xb6d   :  { %v835_v31 = vsub.f32 1.5, %v834_v30 }
 0xb6f   :  { %v836_v32 = vmul.f32 %v971_v26, %v835_v31 }
 0xb71   :  { %v840_v35 = vsel %vm839_vm15, %v971_v26, %v836_v32 }
 0xb72   :  { %v841_v37 = vmul.f32 %v840_v35, %v824_v20 }
 0xb74   :  { %v843_v13 = vmul.f32 %v842_v34, %v841_v37 }
 0xb76   :  { %v845_v38 = vadd.f32 %v844_v36, %v843_v13 }
 0xb78   :  { %847 = vst.msk [vmem:[#allocation5 + $0x2] sm:$0x3] %vm379_vm3, %v845_v38 }
 0xb79   :  { %860 = dma.vmem_to_hbm [thread:$0]  %s853_s3, 64, %s855_s17, [#allocation4], %s1031_s18, %s1031_s18, %s1032_s19  }
 0xb7a   :  { %1022 = dma.done.wait [#allocation4], 64  }
 0xb7b   :  { %1023 = vsyncadd [#allocation4], 4294967232 }
 0xb7c   :  { %865 = vsyncpa [#allocation3], 1 }
 0xb7d   :  { %866 = vsyncpa [#allocation4], 1 }

</bundles_post_ra>
